<compile_context>
chip_gen: v7x
topology: tpu7x:2x2x1
jax: 0.10.0
libtpu: 0.0.40
codegen_flags: <defaults>
</compile_context>

<pallas_src>
import functools
import math

import jax
import jax.numpy as jnp
from jax.experimental import pallas as pl
from jax.experimental.pallas import tpu as pltpu


def _logical_shift_right_i32(x, k):
    # Logical (zero-fill) right shift for int32: arithmetic shift + mask of the
    # sign-extended bits. Avoids any unsigned dtypes / bitcasts in the kernel.
    return (x >> k) & ((1 << (32 - k)) - 1)


def _hash_bits_i32(lin_idx, seed):
    """murmur3-style finalizer in int32 (wrapping int32 mul == uint32 mul bitwise)."""
    h = lin_idx ^ (seed * -1640531527)           # 0x9E3779B9 as int32
    h = h ^ _logical_shift_right_i32(h, 16)
    h = h * -2048144789                          # 0x85EBCA6B as int32
    h = h ^ _logical_shift_right_i32(h, 13)
    h = h * -1028477387                          # 0xC2B2AE35 as int32
    h = h ^ _logical_shift_right_i32(h, 16)
    return h


def _pos_enc_kernel(seed_ref, x_ref, pe_ref, o_ref, *, p, training, block_rows):
    # Broadcast-add in f32 vregs (v5e has no bf16 VPU path); cast back on store.
    y = x_ref[...].astype(jnp.float32) + pe_ref[...].astype(jnp.float32)

    if training and p >= 1.0:
        y = jnp.zeros_like(y)                    # p == 1.0: drop everything (no uint wrap bug)
    elif training and p > 0.0:
        rows, cols = x_ref.shape
        base = pl.program_id(0) * block_rows     # global first row of this tile
        row = jax.lax.broadcasted_iota(jnp.int32, (rows, cols), 0) + base
        col = jax.lax.broadcasted_iota(jnp.int32, (rows, cols), 1)
        lin = row * cols + col                   # global element id => per-tile-unique mask
        bits = _hash_bits_i32(lin, seed_ref[0]) & 0x7FFFFF   # uniform in [0, 2^23)
        thresh = int(p * (1 << 23))              # keep prob == 1 - p to within 2^-23
        keep = bits >= thresh
        y = jnp.where(keep, y * (1.0 / (1.0 - p)), 0.0)
    # TODO(synk): dropout RNG stream cannot bitwise-match torch's RNG (different generator).

    o_ref[...] = y.astype(o_ref.dtype)


def make_positional_encoding(d_model, max_len=5000, dtype=jnp.float32):
    """Same math as the torch __init__: (max_len, 1, d_model) sin/cos table."""
    position = jnp.arange(max_len, dtype=jnp.float32)[:, None]
    div_term = jnp.exp(
        jnp.arange(0, d_model, 2, dtype=jnp.float32) * (-math.log(10000.0) / d_model)
    )
    pe = jnp.zeros((max_len, d_model), dtype=jnp.float32)
    pe = pe.at[:, 0::2].set(jnp.sin(position * div_term))
    pe = pe.at[:, 1::2].set(jnp.cos(position * div_term))
    return pe[:, None, :].astype(dtype)


def positional_encoding_forward(x, pe, *, p=0.1, training=False, seed=0):
    """x: (S, B, D); pe: (max_len, 1, D). Returns dropout(x + pe[:S]) of shape (S, B, D)."""
    S, B, D = x.shape
    cols = B * D

    # Lane-dense 2-D layout: last dim is the full B*D extent (unmasked stores,
    # no (8,128) padding waste for small B, D).
    x2d = x.reshape(S, cols)
    pe2d = jnp.broadcast_to(pe[:S].astype(x.dtype), (S, B, D)).reshape(S, cols)
    seed_arr = jnp.array([seed], dtype=jnp.int32)

    # Seq tile: ~2 MiB of x per block (multiple of 8 sublanes), or the whole
    # sequence if smaller. Double-buffered x/pe/out then stays ~12 MiB,
    # comfortably inside v7x's 64 MiB VMEM.
    row_bytes = cols * x.dtype.itemsize
    if S <= 8:
        ts = S
    else:
        ts = min(S, max(8, ((2 * 1024 * 1024) // max(row_bytes, 1)) // 8 * 8))
    grid = (pl.cdiv(S, ts),)

    kernel = functools.partial(
        _pos_enc_kernel, p=float(p), training=bool(training), block_rows=ts
    )
    out2d = pl.pallas_call(
        kernel,
        out_shape=jax.ShapeDtypeStruct((S, cols), x.dtype),
        grid_spec=pltpu.PrefetchScalarGridSpec(
            num_scalar_prefetch=1,               # dropout seed lands in SMEM
            grid=grid,
            in_specs=[
                pl.BlockSpec((ts, cols), lambda i, seed_ref: (i, 0)),   # x tile
                pl.BlockSpec((ts, cols), lambda i, seed_ref: (i, 0)),   # pe tile
            ],
            out_specs=pl.BlockSpec((ts, cols), lambda i, seed_ref: (i, 0)),
        ),
        compiler_params=pltpu.CompilerParams(
            dimension_semantics=("parallel",),   # shard seq tiles across TCs (v7x); no-op on v5e/v6e
            vmem_limit_bytes=32 * 1024 * 1024,
        ),
    )(seed_arr, x2d, pe2d)

    return out2d.reshape(S, B, D)


if __name__ == "__main__":
    SEQ, BATCH, D_MODEL = 8, 2, 32
    key = jax.random.PRNGKey(0)
    x = jax.random.normal(key, (SEQ, BATCH, D_MODEL), dtype=jnp.float32)
    pe = make_positional_encoding(D_MODEL, max_len=5000)

    ref = x + pe[:SEQ]

    # Eval mode: dropout is identity -> must match x + pe[:S].
    out_eval = jax.block_until_ready(
        positional_encoding_forward(x, pe, p=0.1, training=False)
    )
    assert out_eval.shape == (SEQ, BATCH, D_MODEL)
    assert jnp.allclose(out_eval, ref, atol=1e-6, rtol=1e-6)

    # Training mode: inverted dropout, each element is either 0 or ref/(1-p).
    out_train = jax.block_until_ready(
        positional_encoding_forward(x, pe, p=0.1, training=True, seed=1234)
    )
    kept = out_train != 0.0  # (an element with x+pe exactly 0 would look dropped; benign for random data)
    assert jnp.allclose(
        jnp.where(kept, out_train, 0.0),
        jnp.where(kept, ref / 0.9, 0.0),
        atol=1e-5, rtol=1e-5,
    )

    print("KERNEL_OK")
</pallas_src>

<mosaic_0001>
module attributes {stable_mosaic.version = 11 : i64} {
  func.func @_pos_enc_kernel(%arg0: i32, %arg1: memref<1xi32, #tpu.memory_space<smem>>, %arg2: memref<8x64xf32, #tpu.memory_space<vmem>>, %arg3: memref<8x64xf32, #tpu.memory_space<vmem>>, %arg4: memref<8x64xf32, #tpu.memory_space<vmem>>) attributes {dimension_semantics = [#tpu.dimension_semantics<parallel>], iteration_bounds = array<i64: 1>, scalar_prefetch = 1 : i64, scratch_operands = 0 : i64, tpu.core_type = #tpu.core_type<tc>, window_params = [{transform_indices = @transform_0, window_bounds = array<i64: 8, 64>}, {transform_indices = @transform_1, window_bounds = array<i64: 8, 64>}, {transform_indices = @transform_2, window_bounds = array<i64: 8, 64>}]} {
    %c0 = arith.constant 0 : index
    %c0_0 = arith.constant 0 : index
    %0 = vector.load %arg2[%c0, %c0_0] : memref<8x64xf32, #tpu.memory_space<vmem>>, vector<8x64xf32>
    %c0_1 = arith.constant 0 : index
    %c0_2 = arith.constant 0 : index
    %1 = vector.load %arg3[%c0_1, %c0_2] : memref<8x64xf32, #tpu.memory_space<vmem>>, vector<8x64xf32>
    %2 = arith.addf %0, %1 : vector<8x64xf32>
    %c0_3 = arith.constant 0 : index
    %c0_4 = arith.constant 0 : index
    %3 = vector.load %arg4[%c0_3, %c0_4] : memref<8x64xf32, #tpu.memory_space<vmem>>, vector<8x64xf32>
    tpu.vector_store %arg4[%c0_3, %c0_4], %2 {strides = array<i32>} : memref<8x64xf32, #tpu.memory_space<vmem>>, vector<8x64xf32>,
    return
  }
  func.func @transform_0(%arg0: i32, %arg1: memref<1xi32, #tpu.memory_space<smem>>) -> (i32, i32) {
    %c0_i32 = arith.constant 0 : i32
    %c0_i32_0 = arith.constant 0 : i32
    return %arg0, %c0_i32 : i32, i32
  }
  func.func @transform_1(%arg0: i32, %arg1: memref<1xi32, #tpu.memory_space<smem>>) -> (i32, i32) {
    %c0_i32 = arith.constant 0 : i32
    %c0_i32_0 = arith.constant 0 : i32
    return %arg0, %c0_i32 : i32, i32
  }
  func.func @transform_2(%arg0: i32, %arg1: memref<1xi32, #tpu.memory_space<smem>>) -> (i32, i32) {
    %c0_i32 = arith.constant 0 : i32
    %c0_i32_0 = arith.constant 0 : i32
    return %arg0, %c0_i32 : i32, i32
  }
}

</mosaic_0001>

<bundles_post_ra>
// kernel: tpu_custom_call.1
= control target key start
LH: loop header
LB: loop body
LE: loop exit
PB: predicated region body
PF: predicated region fallthrough
CT: control target
= control target key end

     0   :  { %9 = vsyncpa [#allocation5], 0  ;;  %s193_s0 = inlined_call_operand.<no memory space> [shape: s32[1], index: 0, kind: input, shape index: {}]   ;;  %s194_s1 = inlined_call_operand.hbm [shape: f32[8,64], index: 1, kind: input, shape index: {}]   ;;  %s195_s2 = inlined_call_operand.hbm [shape: f32[8,64], index: 2, kind: input, shape index: {}]   ;;  %s196_s3 = inlined_call_operand.hbm [shape: f32[8,64], index: 3, kind: output, shape index: {}]  }
   0x1   :  { %10 = vsyncpa [#allocation8], 0 }
   0x2   :  { %11 = vsyncpa [#allocation6], 0  ;;  %s134_s12 = smov [#allocation4]   ;;  %s135_s14 = smov [#allocation7]  }
   0x3   :  { %s18_s13 = sshll.u32 %s134_s12, 4  ;;  %s28_s15 = sshll.u32 %s135_s14, 4  ;;  %s19_s13 = int_to_ptr.vmem [resolvable:$true] %s18_s13  ;;  %s29_s15 = int_to_ptr.vmem [resolvable:$true] %s28_s15 }
   0x4   :  { %s62_s17 = scalar_lea.hbm %s194_s1, 128 }
   0x5   :  { %p63_p0 = scmp.ne.s32.totalorder %s194_s1, %s62_s17  ;;  %p66_p1 = scmp.lt.u32.totalorder %s62_s17, %s194_s1 }
   0x7   :  { %p68_p2 = pnand %p66_p1, %p63_p0 }
   0x9   :  { %71 = shalt.err (!%p68_p2)
}
   0xa   :  { %s72_s22 = scalar_lea.vmem %s19_s13, 128  ;;  %p77_p4 = scmp.lt.s32.totalorder %s19_s13, %s19_s13 }
   0xb   :  { %p73_p3 = scmp.ne.s32.totalorder %s19_s13, %s72_s22  ;;  %p78_p5 = scmp.lt.s32.totalorder %s72_s22, %s72_s22 }
   0xd   :  { %p79_p6 = por %p78_p5, %p77_p4 }
   0xf   :  { %p80_p7 = pnand %p79_p6, %p73_p3 }
  0x11   :  { %83 = shalt.err (!%p80_p7)
}
  0x12   :  { %21 = dma.hbm_to_vmem [thread:$0]  %s194_s1, 128, %s19_s13, [#allocation5]  }
  0x13   :  { %s84_s27 = scalar_lea.hbm %s195_s2, 128 }
  0x14   :  { %p85_p8 = scmp.ne.s32.totalorder %s195_s2, %s84_s27  ;;  %p88_p9 = scmp.lt.u32.totalorder %s84_s27, %s195_s2 }
  0x16   :  { %p90_p10 = pnand %p88_p9, %p85_p8 }
  0x18   :  { %93 = shalt.err (!%p90_p10)
}
  0x19   :  { %s94_s5 = scalar_lea.vmem %s29_s15, 128  ;;  %p99_p12 = scmp.lt.s32.totalorder %s29_s15, %s29_s15 }
  0x1a   :  { %p95_p11 = scmp.ne.s32.totalorder %s29_s15, %s94_s5  ;;  %p100_p13 = scmp.lt.s32.totalorder %s94_s5, %s94_s5 }
  0x1c   :  { %p101_p0 = por %p100_p13, %p99_p12 }
  0x1e   :  { %p102_p1 = pnand %p101_p0, %p95_p11 }
  0x20   :  { %105 = shalt.err (!%p102_p1)
}
  0x21   :  { %31 = dma.hbm_to_vmem [thread:$0]  %s195_s2, 128, %s29_s15, [#allocation8]  }
  0x22   :  { %128 = dma.done.wait [#allocation5], 128  }
  0x23   :  { %129 = vsyncadd [#allocation5], 4294967168 }
  0x24   :  { %130 = dma.done.wait [#allocation8], 128  }
  0x25   :  { %131 = vsyncadd [#allocation8], 4294967168  ;;  %s136_s7 = smov [#allocation9]   ;;  %v38_v0 = vld [vmem:[#allocation4] sm:$0xff]  ;;  %v39_v1 = vld [vmem:[#allocation7] sm:$0xff]  ;;  %vm41_vm0 = vcmask 523264  }
  0x26   :  { %s49_s8 = sshll.u32 %s136_s7, 4  ;;  %v40_v2 = vadd.f32 %v39_v1, %v38_v0  ;;  %s50_s8 = int_to_ptr.vmem [resolvable:$true] %s49_s8 }
  0x27   :  { %s106_s9 = scalar_lea.vmem %s50_s8, 128  ;;  %p111_p3 = scmp.lt.s32.totalorder %s50_s8, %s50_s8 }
  0x28   :  { %42 = vst.msk [vmem:[#allocation9] sm:$0xff] %vm41_vm0, %v40_v2  ;;  %p107_p2 = scmp.ne.s32.totalorder %s50_s8, %s106_s9  ;;  %p112_p4 = scmp.lt.s32.totalorder %s106_s9, %s106_s9 }
  0x2a   :  { %p113_p5 = por %p112_p4, %p111_p3 }
  0x2c   :  { %p114_p6 = pnand %p113_p5, %p107_p2 }
  0x2e   :  { %117 = shalt.err (!%p114_p6)
}
  0x2f   :  { %s118_s11 = scalar_lea.hbm %s196_s3, 128 }
  0x30   :  { %p119_p7 = scmp.ne.s32.totalorder %s196_s3, %s118_s11  ;;  %p122_p8 = scmp.lt.u32.totalorder %s118_s11, %s196_s3 }
  0x32   :  { %p124_p9 = pnand %p122_p8, %p119_p7 }
  0x34   :  { %127 = shalt.err (!%p124_p9)
}
  0x35   :  { %52 = dma.vmem_to_hbm [thread:$0]  %s50_s8, 128, %s196_s3, [#allocation6]  }
  0x36   :  { %132 = dma.done.wait [#allocation6], 128  }
  0x37   :  { %133 = vsyncadd [#allocation6], 4294967168 }
  0x38   :  { %56 = vsyncpa [#allocation5], 1 }
  0x39   :  { %57 = vsyncpa [#allocation8], 1 }
  0x3a   :  { %58 = vsyncpa [#allocation6], 1 }

</bundles_post_ra>
